<compile_context>
chip_gen: v7x
topology: tpu7x:2x2x1
jax: 0.10.0
libtpu: 0.0.40
codegen_flags: <defaults>
</compile_context>

<pallas_src>
import functools
import math

import jax
import jax.numpy as jnp
from jax.experimental import pallas as pl
from jax.experimental.pallas import tpu as pltpu

NCPAD = 128  # lane-dense padded class width


# ----------------------------------------------------------------------------
# Fused forward kernel (grid-less: every array is one whole-VMEM block)
# ----------------------------------------------------------------------------

def _gcn_forward_kernel(nhidlayer, nfeat,
                        fea_ref, adj_ref,
                        w_in_ref, sc_in_ref, sh_in_ref,
                        w_mid_ref, sc_mid_ref, sh_mid_ref,
                        w_out_ref, sc_out_ref, sh_out_ref,
                        o_ref,
                        h_ref):
    f32 = jnp.float32
    bf16 = jnp.bfloat16

    fea = fea_ref[...]            # (N, nfeat)  bf16
    adj = adj_ref[...]            # (N, N)      bf16
    nhid = sc_in_ref.shape[-1]
    ncpad = sc_out_ref.shape[-1]

    # persistent h-slab: [ fea | x ]  (fea columns written once)
    h_ref[:, :nfeat] = fea

    def gc_layer(h_bf16, w_both, sc, sh, width):
        # single fused matmul: h @ [W | W_self] -> (N, 2*width)
        both = jnp.dot(h_bf16, w_both, preferred_element_type=f32)
        sup = both[:, :width]
        slf = both[:, width:]
        y = jnp.dot(adj, sup.astype(bf16), preferred_element_type=f32) + slf
        return y * sc + sh        # fused bias + eval BatchNorm (f32)

    # ---- input GraphConvolutionBS: nfeat -> nhid ----
    x = gc_layer(fea, w_in_ref[...], sc_in_ref[...], sh_in_ref[...], nhid)
    h_ref[:, nfeat:] = x.astype(bf16)

    # ---- hidden GraphConvolutionBS layers on cat([fea, x]) (h-slab, one matmul) ----
    for i in range(nhidlayer):    # static unrolled loop; weights stacked on axis 0
        x = gc_layer(h_ref[...], w_mid_ref[i], sc_mid_ref[i], sh_mid_ref[i], nhid)
        h_ref[:, nfeat:] = x.astype(bf16)

    # ---- output GraphConvolutionBS: (nfeat + nhid) -> nclass (padded to ncpad) ----
    # padded columns: weight cols are zero, scale 0, shift -1e30 => y_pad = -1e30
    y = gc_layer(h_ref[...], w_out_ref[...], sc_out_ref[...], sh_out_ref[...], ncpad)

    # ---- log_softmax over the class axis (dim=1); padded cols vanish in exp ----
    m = jnp.max(y, axis=-1, keepdims=True)
    lse = jnp.log(jnp.sum(jnp.exp(y - m), axis=-1, keepdims=True)) + m
    o_ref[...] = (y - lse).astype(o_ref.dtype)


def _full_spec(shape):
    # block == full array (no tiling); index_map returns the single block.
    return pl.BlockSpec(shape, lambda: (0,) * len(shape))


def _vmem_limit_bytes(resident_bytes):
    try:
        cap = int(pltpu.get_tpu_info().vmem_capacity_bytes)
    except Exception:
        cap = 64 * 1024 * 1024           # conservative (v7x) fallback
    want = int(2 * resident_bytes) + (8 << 20)   # double-buffer + headroom
    return max(32 << 20, min(want, cap - (4 << 20)))


def gcn_forward(params, fea, adj, nclass):
    n, nfeat = fea.shape
    nhid = params["in"]["sc"].shape[-1]
    ncpad = params["out"]["sc"].shape[-1]
    nhidlayer = params["mid"]["w"].shape[0]

    # bf16 MXU operands (f32 accumulation inside the kernel)
    fea_b = fea.astype(jnp.bfloat16)
    adj_b = adj.astype(jnp.bfloat16)

    inputs = (
        fea_b, adj_b,
        params["in"]["w"], params["in"]["sc"], params["in"]["sh"],
        params["mid"]["w"], params["mid"]["sc"], params["mid"]["sh"],
        params["out"]["w"], params["out"]["sc"], params["out"]["sh"],
    )

    resident = (sum(a.size * a.dtype.itemsize for a in inputs)
                + n * ncpad * 4                 # output
                + n * (nfeat + nhid) * 2)       # h-slab scratch (bf16)

    out_pad = pl.pallas_call(
        functools.partial(_gcn_forward_kernel, nhidlayer, nfeat),
        out_shape=jax.ShapeDtypeStruct((n, ncpad), jnp.float32),
        in_specs=[_full_spec(a.shape) for a in inputs],
        out_specs=_full_spec((n, ncpad)),
        scratch_shapes=[pltpu.VMEM((n, nfeat + nhid), jnp.bfloat16)],
        compiler_params=pltpu.CompilerParams(
            vmem_limit_bytes=_vmem_limit_bytes(resident)),
    )(*inputs)

    return out_pad[:, :nclass]


gcn_forward_jit = jax.jit(gcn_forward, static_argnames=("nclass",))


# ----------------------------------------------------------------------------
# Parameter construction (eval-mode BN stats + bias folded into scale/shift,
# W and W_self concatenated along the output axis, output layer lane-padded)
# ----------------------------------------------------------------------------

def init_params(key, nfeat, nhid, nclass, nhidlayer, ncpad=NCPAD):
    bn_eps = 1e-5
    keys = iter(jax.random.split(key, 3 + 3 * nhidlayer + 3))

    def u(k, shape, fan_out):
        stdv = 1.0 / math.sqrt(fan_out)
        return jax.random.uniform(k, shape, minval=-stdv, maxval=stdv, dtype=jnp.float32)

    def fold_bn(bias, out):
        # TODO(synk): freshly-initialized eval BN stats (gamma=1, beta=0, mean=0, var=1);
        #             a trained checkpoint must fold its running_mean/running_var here.
        scale = jnp.ones((1, out), jnp.float32) / jnp.sqrt(1.0 + bn_eps)
        shift = bias * scale
        return scale, shift

    bf16 = jnp.bfloat16
    params, raw = {}, {}

    # input layer: GraphConvolutionBS(nfeat, nhid)
    w = u(next(keys), (nfeat, nhid), nhid)
    wl = u(next(keys), (nfeat, nhid), nhid)
    b = u(next(keys), (1, nhid), nhid)
    sc, sh = fold_bn(b, nhid)
    params["in"] = {"w": jnp.concatenate([w, wl], axis=1).astype(bf16), "sc": sc, "sh": sh}
    raw["in"] = {"w": w, "wl": wl, "sc": sc, "sh": sh}

    # hidden layers: GraphConvolutionBS(nfeat + nhid, nhid)
    w_mid, sc_mid, sh_mid, raw_mid = [], [], [], []
    for _ in range(nhidlayer):
        w = u(next(keys), (nfeat + nhid, nhid), nhid)
        wl = u(next(keys), (nfeat + nhid, nhid), nhid)
        b = u(next(keys), (1, nhid), nhid)
        sc, sh = fold_bn(b, nhid)
        w_mid.append(jnp.concatenate([w, wl], axis=1).astype(bf16))
        sc_mid.append(sc)
        sh_mid.append(sh)
        raw_mid.append({"w": w, "wl": wl, "sc": sc, "sh": sh})
    params["mid"] = {"w": jnp.stack(w_mid), "sc": jnp.stack(sc_mid), "sh": jnp.stack(sh_mid)}
    raw["mid"] = raw_mid

    # output layer: GraphConvolutionBS(nfeat + nhid, nclass), lane-padded to ncpad
    w = u(next(keys), (nfeat + nhid, nclass), nclass)
    wl = u(next(keys), (nfeat + nhid, nclass), nclass)
    b = u(next(keys), (1, nclass), nclass)
    sc, sh = fold_bn(b, nclass)
    w_pad = jnp.zeros((nfeat + nhid, ncpad), jnp.float32).at[:, :nclass].set(w)
    wl_pad = jnp.zeros((nfeat + nhid, ncpad), jnp.float32).at[:, :nclass].set(wl)
    sc_pad = jnp.zeros((1, ncpad), jnp.float32).at[:, :nclass].set(sc)
    sh_pad = jnp.full((1, ncpad), -1e30, jnp.float32).at[:, :nclass].set(sh)
    params["out"] = {"w": jnp.concatenate([w_pad, wl_pad], axis=1).astype(bf16),
                     "sc": sc_pad, "sh": sh_pad}
    raw["out"] = {"w": w, "wl": wl, "sc": sc, "sh": sh}
    return params, raw


# ----------------------------------------------------------------------------
# References for validation
# ----------------------------------------------------------------------------

def reference_forward_bf16(params, fea, adj, nclass):
    """Pure-JAX mirror of the kernel math (bf16 operands, f32 accumulation)."""
    bf16, f32 = jnp.bfloat16, jnp.float32
    fea_b = fea.astype(bf16)
    adj_b = adj.astype(bf16)
    nhid = params["in"]["sc"].shape[-1]
    ncpad = params["out"]["sc"].shape[-1]

    def layer(h_b, w_both, sc, sh, width):
        both = jnp.dot(h_b, w_both, preferred_element_type=f32)
        sup, slf = both[:, :width], both[:, width:]
        y = jnp.dot(adj_b, sup.astype(bf16), preferred_element_type=f32) + slf
        return y * sc + sh

    x = layer(fea_b, params["in"]["w"], params["in"]["sc"], params["in"]["sh"], nhid)
    for i in range(params["mid"]["w"].shape[0]):
        h = jnp.concatenate([fea_b, x.astype(bf16)], axis=-1)
        x = layer(h, params["mid"]["w"][i], params["mid"]["sc"][i], params["mid"]["sh"][i], nhid)
    h = jnp.concatenate([fea_b, x.astype(bf16)], axis=-1)
    y = layer(h, params["out"]["w"], params["out"]["sc"], params["out"]["sh"], ncpad)
    return jax.nn.log_softmax(y, axis=1)[:, :nclass]


def reference_forward_f32(raw, fea, adj):
    """Full-precision reference with the explicit concat (original semantics)."""
    def gcbs(h, w, wl, sc, sh):
        y = adj @ (h @ w) + h @ wl
        return y * sc + sh

    x = gcbs(fea, raw["in"]["w"], raw["in"]["wl"], raw["in"]["sc"], raw["in"]["sh"])
    for lay in raw["mid"]:
        h = jnp.concatenate([fea, x], axis=-1)
        x = gcbs(h, lay["w"], lay["wl"], lay["sc"], lay["sh"])
    h = jnp.concatenate([fea, x], axis=-1)
    y = gcbs(h, raw["out"]["w"], raw["out"]["wl"], raw["out"]["sc"], raw["out"]["sh"])
    return jax.nn.log_softmax(y, axis=1)


# ----------------------------------------------------------------------------
# Main
# ----------------------------------------------------------------------------

if __name__ == "__main__":
    N, NFEAT, NHID, NCLASS, NHIDLAYER = 16, 8, 32, 4, 2

    key = jax.random.PRNGKey(0)
    k_fea, k_adj, k_par = jax.random.split(key, 3)

    fea = jax.random.normal(k_fea, (N, NFEAT), dtype=jnp.float32)
    # random symmetric adjacency with self loops, row-normalized (GCN style)
    a = (jax.random.uniform(k_adj, (N, N)) > 0.7).astype(jnp.float32)
    adj = jnp.clip(a + a.T + jnp.eye(N, dtype=jnp.float32), 0.0, 1.0)
    adj = adj / jnp.sum(adj, axis=1, keepdims=True)

    params, raw = init_params(k_par, NFEAT, NHID, NCLASS, NHIDLAYER)

    out = gcn_forward_jit(params, fea, adj, nclass=NCLASS)
    out = jax.block_until_ready(out)

    assert out.shape == (N, NCLASS)
    # rows of log_softmax must exp-sum to 1
    assert bool(jnp.allclose(jnp.sum(jnp.exp(out), axis=1), 1.0, atol=1e-4))
    # match the precision-matched (bf16-operand) reference tightly
    ref_b = reference_forward_bf16(params, fea, adj, NCLASS)
    assert bool(jnp.allclose(out, ref_b, atol=2e-3, rtol=2e-3))
    # match the full-precision reference with bf16-appropriate tolerance
    ref_f = reference_forward_f32(raw, fea, adj)
    assert bool(jnp.allclose(out, ref_f, atol=5e-2, rtol=5e-2))

    print("KERNEL_OK")
</pallas_src>

<mosaic_0001>
module attributes {stable_mosaic.version = 11 : i64} {
  func.func @_gcn_forward_kernel(%arg0: memref<16x8xbf16, #tpu.memory_space<vmem>>, %arg1: memref<16x16xbf16, #tpu.memory_space<vmem>>, %arg2: memref<8x64xbf16, #tpu.memory_space<vmem>>, %arg3: memref<1x32xf32, #tpu.memory_space<vmem>>, %arg4: memref<1x32xf32, #tpu.memory_space<vmem>>, %arg5: memref<2x40x64xbf16, #tpu.memory_space<vmem>>, %arg6: memref<2x1x32xf32, #tpu.memory_space<vmem>>, %arg7: memref<2x1x32xf32, #tpu.memory_space<vmem>>, %arg8: memref<40x256xbf16, #tpu.memory_space<vmem>>, %arg9: memref<1x128xf32, #tpu.memory_space<vmem>>, %arg10: memref<1x128xf32, #tpu.memory_space<vmem>>, %arg11: memref<16x128xf32, #tpu.memory_space<vmem>>, %arg12: memref<16x40xbf16, #tpu.memory_space<vmem>>) attributes {dimension_semantics = [], scalar_prefetch = 0 : i64, scratch_operands = 1 : i64, tpu.core_type = #tpu.core_type<tc>} {
    %c0 = arith.constant 0 : index
    %c0_0 = arith.constant 0 : index
    %0 = vector.load %arg0[%c0, %c0_0] : memref<16x8xbf16, #tpu.memory_space<vmem>>, vector<16x8xbf16>
    %c0_1 = arith.constant 0 : index
    %c0_2 = arith.constant 0 : index
    %1 = vector.load %arg1[%c0_1, %c0_2] : memref<16x16xbf16, #tpu.memory_space<vmem>>, vector<16x16xbf16>
    %c0_3 = arith.constant 0 : index
    %c0_4 = arith.constant 0 : index
    %2 = vector.load %arg12[%c0_3, %c0_4] : memref<16x40xbf16, #tpu.memory_space<vmem>>, vector<16x8xbf16>
    tpu.vector_store %arg12[%c0_3, %c0_4], %0 {strides = array<i32>} : memref<16x40xbf16, #tpu.memory_space<vmem>>, vector<16x8xbf16>,
    %c0_5 = arith.constant 0 : index
    %c0_6 = arith.constant 0 : index
    %3 = vector.load %arg2[%c0_5, %c0_6] : memref<8x64xbf16, #tpu.memory_space<vmem>>, vector<8x64xbf16>
    %c0_7 = arith.constant 0 : index
    %c0_8 = arith.constant 0 : index
    %4 = vector.load %arg3[%c0_7, %c0_8] : memref<1x32xf32, #tpu.memory_space<vmem>>, vector<1x32xf32>
    %c0_9 = arith.constant 0 : index
    %c0_10 = arith.constant 0 : index
    %5 = vector.load %arg4[%c0_9, %c0_10] : memref<1x32xf32, #tpu.memory_space<vmem>>, vector<1x32xf32>
    %cst = arith.constant dense<0.000000e+00> : vector<16x64xf32>
    %6 = tpu.matmul %0, %3, %cst {dimension_numbers = #tpu.dot_dimension_numbers<[1], [0], [0], [1], [0, 0, 1, 1], [], []>} : vector<16x8xbf16>, vector<8x64xbf16>, vector<16x64xf32> -> vector<16x64xf32>
    %7 = vector.extract_strided_slice %6 {offsets = [0, 0], sizes = [16, 32], strides = [1, 1]} : vector<16x64xf32> to vector<16x32xf32>
    %8 = vector.extract_strided_slice %6 {offsets = [0, 32], sizes = [16, 32], strides = [1, 1]} : vector<16x64xf32> to vector<16x32xf32>
    %9 = arith.truncf %7 : vector<16x32xf32> to vector<16x32xbf16>
    %cst_11 = arith.constant dense<0.000000e+00> : vector<16x32xf32>
    %10 = tpu.matmul %1, %9, %cst_11 {dimension_numbers = #tpu.dot_dimension_numbers<[1], [0], [0], [1], [0, 0, 1, 1], [], []>} : vector<16x16xbf16>, vector<16x32xbf16>, vector<16x32xf32> -> vector<16x32xf32>
    %11 = arith.addf %10, %8 : vector<16x32xf32>
    %12 = vector.broadcast %4 : vector<1x32xf32> to vector<16x32xf32>
    %13 = arith.mulf %11, %12 : vector<16x32xf32>
    %14 = vector.broadcast %5 : vector<1x32xf32> to vector<16x32xf32>
    %15 = arith.addf %13, %14 : vector<16x32xf32>
    %16 = arith.truncf %15 : vector<16x32xf32> to vector<16x32xbf16>
    %c0_12 = arith.constant 0 : index
    %c8 = arith.constant 8 : index
    %17 = vector.load %arg12[%c0_12, %c8] : memref<16x40xbf16, #tpu.memory_space<vmem>>, vector<16x32xbf16>
    tpu.vector_store %arg12[%c0_12, %c8], %16 {strides = array<i32>} : memref<16x40xbf16, #tpu.memory_space<vmem>>, vector<16x32xbf16>,
    %c0_13 = arith.constant 0 : index
    %c0_14 = arith.constant 0 : index
    %18 = vector.load %arg12[%c0_13, %c0_14] : memref<16x40xbf16, #tpu.memory_space<vmem>>, vector<16x40xbf16>
    %c0_15 = arith.constant 0 : index
    %c0_16 = arith.constant 0 : index
    %c0_17 = arith.constant 0 : index
    %19 = vector.load %arg5[%c0_15, %c0_16, %c0_17] : memref<2x40x64xbf16, #tpu.memory_space<vmem>>, vector<1x40x64xbf16>
    %20 = vector.shape_cast %19 : vector<1x40x64xbf16> to vector<40x64xbf16>
    %c0_18 = arith.constant 0 : index
    %c0_19 = arith.constant 0 : index
    %c0_20 = arith.constant 0 : index
    %21 = vector.load %arg6[%c0_18, %c0_19, %c0_20] : memref<2x1x32xf32, #tpu.memory_space<vmem>>, vector<1x1x32xf32>
    %22 = vector.shape_cast %21 : vector<1x1x32xf32> to vector<1x32xf32>
    %c0_21 = arith.constant 0 : index
    %c0_22 = arith.constant 0 : index
    %c0_23 = arith.constant 0 : index
    %23 = vector.load %arg7[%c0_21, %c0_22, %c0_23] : memref<2x1x32xf32, #tpu.memory_space<vmem>>, vector<1x1x32xf32>
    %24 = vector.shape_cast %23 : vector<1x1x32xf32> to vector<1x32xf32>
    %cst_24 = arith.constant dense<0.000000e+00> : vector<16x64xf32>
    %25 = tpu.matmul %18, %20, %cst_24 {dimension_numbers = #tpu.dot_dimension_numbers<[1], [0], [0], [1], [0, 0, 1, 1], [], []>} : vector<16x40xbf16>, vector<40x64xbf16>, vector<16x64xf32> -> vector<16x64xf32>
    %26 = vector.extract_strided_slice %25 {offsets = [0, 0], sizes = [16, 32], strides = [1, 1]} : vector<16x64xf32> to vector<16x32xf32>
    %27 = vector.extract_strided_slice %25 {offsets = [0, 32], sizes = [16, 32], strides = [1, 1]} : vector<16x64xf32> to vector<16x32xf32>
    %28 = arith.truncf %26 : vector<16x32xf32> to vector<16x32xbf16>
    %cst_25 = arith.constant dense<0.000000e+00> : vector<16x32xf32>
    %29 = tpu.matmul %1, %28, %cst_25 {dimension_numbers = #tpu.dot_dimension_numbers<[1], [0], [0], [1], [0, 0, 1, 1], [], []>} : vector<16x16xbf16>, vector<16x32xbf16>, vector<16x32xf32> -> vector<16x32xf32>
    %30 = arith.addf %29, %27 : vector<16x32xf32>
    %31 = vector.broadcast %22 : vector<1x32xf32> to vector<16x32xf32>
    %32 = arith.mulf %30, %31 : vector<16x32xf32>
    %33 = vector.broadcast %24 : vector<1x32xf32> to vector<16x32xf32>
    %34 = arith.addf %32, %33 : vector<16x32xf32>
    %35 = arith.truncf %34 : vector<16x32xf32> to vector<16x32xbf16>
    %c0_26 = arith.constant 0 : index
    %c8_27 = arith.constant 8 : index
    %36 = vector.load %arg12[%c0_26, %c8_27] : memref<16x40xbf16, #tpu.memory_space<vmem>>, vector<16x32xbf16>
    tpu.vector_store %arg12[%c0_26, %c8_27], %35 {strides = array<i32>} : memref<16x40xbf16, #tpu.memory_space<vmem>>, vector<16x32xbf16>,
    %c0_28 = arith.constant 0 : index
    %c0_29 = arith.constant 0 : index
    %37 = vector.load %arg12[%c0_28, %c0_29] : memref<16x40xbf16, #tpu.memory_space<vmem>>, vector<16x40xbf16>
    %c1 = arith.constant 1 : index
    %c0_30 = arith.constant 0 : index
    %c0_31 = arith.constant 0 : index
    %38 = vector.load %arg5[%c1, %c0_30, %c0_31] : memref<2x40x64xbf16, #tpu.memory_space<vmem>>, vector<1x40x64xbf16>
    %39 = vector.shape_cast %38 : vector<1x40x64xbf16> to vector<40x64xbf16>
    %c1_32 = arith.constant 1 : index
    %c0_33 = arith.constant 0 : index
    %c0_34 = arith.constant 0 : index
    %40 = vector.load %arg6[%c1_32, %c0_33, %c0_34] : memref<2x1x32xf32, #tpu.memory_space<vmem>>, vector<1x1x32xf32>
    %41 = vector.shape_cast %40 : vector<1x1x32xf32> to vector<1x32xf32>
    %c1_35 = arith.constant 1 : index
    %c0_36 = arith.constant 0 : index
    %c0_37 = arith.constant 0 : index
    %42 = vector.load %arg7[%c1_35, %c0_36, %c0_37] : memref<2x1x32xf32, #tpu.memory_space<vmem>>, vector<1x1x32xf32>
    %43 = vector.shape_cast %42 : vector<1x1x32xf32> to vector<1x32xf32>
    %cst_38 = arith.constant dense<0.000000e+00> : vector<16x64xf32>
    %44 = tpu.matmul %37, %39, %cst_38 {dimension_numbers = #tpu.dot_dimension_numbers<[1], [0], [0], [1], [0, 0, 1, 1], [], []>} : vector<16x40xbf16>, vector<40x64xbf16>, vector<16x64xf32> -> vector<16x64xf32>
    %45 = vector.extract_strided_slice %44 {offsets = [0, 0], sizes = [16, 32], strides = [1, 1]} : vector<16x64xf32> to vector<16x32xf32>
    %46 = vector.extract_strided_slice %44 {offsets = [0, 32], sizes = [16, 32], strides = [1, 1]} : vector<16x64xf32> to vector<16x32xf32>
    %47 = arith.truncf %45 : vector<16x32xf32> to vector<16x32xbf16>
    %cst_39 = arith.constant dense<0.000000e+00> : vector<16x32xf32>
    %48 = tpu.matmul %1, %47, %cst_39 {dimension_numbers = #tpu.dot_dimension_numbers<[1], [0], [0], [1], [0, 0, 1, 1], [], []>} : vector<16x16xbf16>, vector<16x32xbf16>, vector<16x32xf32> -> vector<16x32xf32>
    %49 = arith.addf %48, %46 : vector<16x32xf32>
    %50 = vector.broadcast %41 : vector<1x32xf32> to vector<16x32xf32>
    %51 = arith.mulf %49, %50 : vector<16x32xf32>
    %52 = vector.broadcast %43 : vector<1x32xf32> to vector<16x32xf32>
    %53 = arith.addf %51, %52 : vector<16x32xf32>
    %54 = arith.truncf %53 : vector<16x32xf32> to vector<16x32xbf16>
    %c0_40 = arith.constant 0 : index
    %c8_41 = arith.constant 8 : index
    %55 = vector.load %arg12[%c0_40, %c8_41] : memref<16x40xbf16, #tpu.memory_space<vmem>>, vector<16x32xbf16>
    tpu.vector_store %arg12[%c0_40, %c8_41], %54 {strides = array<i32>} : memref<16x40xbf16, #tpu.memory_space<vmem>>, vector<16x32xbf16>,
    %c0_42 = arith.constant 0 : index
    %c0_43 = arith.constant 0 : index
    %56 = vector.load %arg12[%c0_42, %c0_43] : memref<16x40xbf16, #tpu.memory_space<vmem>>, vector<16x40xbf16>
    %c0_44 = arith.constant 0 : index
    %c0_45 = arith.constant 0 : index
    %57 = vector.load %arg8[%c0_44, %c0_45] : memref<40x256xbf16, #tpu.memory_space<vmem>>, vector<40x256xbf16>
    %c0_46 = arith.constant 0 : index
    %c0_47 = arith.constant 0 : index
    %58 = vector.load %arg9[%c0_46, %c0_47] : memref<1x128xf32, #tpu.memory_space<vmem>>, vector<1x128xf32>
    %c0_48 = arith.constant 0 : index
    %c0_49 = arith.constant 0 : index
    %59 = vector.load %arg10[%c0_48, %c0_49] : memref<1x128xf32, #tpu.memory_space<vmem>>, vector<1x128xf32>
    %cst_50 = arith.constant dense<0.000000e+00> : vector<16x256xf32>
    %60 = tpu.matmul %56, %57, %cst_50 {dimension_numbers = #tpu.dot_dimension_numbers<[1], [0], [0], [1], [0, 0, 1, 1], [], []>} : vector<16x40xbf16>, vector<40x256xbf16>, vector<16x256xf32> -> vector<16x256xf32>
    %61 = vector.extract_strided_slice %60 {offsets = [0, 0], sizes = [16, 128], strides = [1, 1]} : vector<16x256xf32> to vector<16x128xf32>
    %62 = vector.extract_strided_slice %60 {offsets = [0, 128], sizes = [16, 128], strides = [1, 1]} : vector<16x256xf32> to vector<16x128xf32>
    %63 = arith.truncf %61 : vector<16x128xf32> to vector<16x128xbf16>
    %cst_51 = arith.constant dense<0.000000e+00> : vector<16x128xf32>
    %64 = tpu.matmul %1, %63, %cst_51 {dimension_numbers = #tpu.dot_dimension_numbers<[1], [0], [0], [1], [0, 0, 1, 1], [], []>} : vector<16x16xbf16>, vector<16x128xbf16>, vector<16x128xf32> -> vector<16x128xf32>
    %65 = arith.addf %64, %62 : vector<16x128xf32>
    %66 = vector.broadcast %58 : vector<1x128xf32> to vector<16x128xf32>
    %67 = arith.mulf %65, %66 : vector<16x128xf32>
    %68 = vector.broadcast %59 : vector<1x128xf32> to vector<16x128xf32>
    %69 = arith.addf %67, %68 : vector<16x128xf32>
    %cst_52 = arith.constant dense<0xFF800000> : vector<16xf32>
    %70 = vector.multi_reduction <maximumf>, %69, %cst_52 [1] : vector<16x128xf32> to vector<16xf32>
    %71 = vector.shape_cast %70 : vector<16xf32> to vector<16x1xf32>
    %72 = vector.broadcast %71 : vector<16x1xf32> to vector<16x128xf32>
    %73 = arith.subf %69, %72 : vector<16x128xf32>
    %74 = math.exp %73 : vector<16x128xf32>
    %cst_53 = arith.constant dense<0.000000e+00> : vector<16xf32>
    %75 = vector.multi_reduction <add>, %74, %cst_53 [1] : vector<16x128xf32> to vector<16xf32>
    %76 = vector.shape_cast %75 : vector<16xf32> to vector<16x1xf32>
    %77 = math.log %76 : vector<16x1xf32>
    %78 = arith.addf %77, %71 : vector<16x1xf32>
    %79 = vector.broadcast %78 : vector<16x1xf32> to vector<16x128xf32>
    %80 = arith.subf %69, %79 : vector<16x128xf32>
    %c0_54 = arith.constant 0 : index
    %c0_55 = arith.constant 0 : index
    %81 = vector.load %arg11[%c0_54, %c0_55] : memref<16x128xf32, #tpu.memory_space<vmem>>, vector<16x128xf32>
    tpu.vector_store %arg11[%c0_54, %c0_55], %80 {strides = array<i32>} : memref<16x128xf32, #tpu.memory_space<vmem>>, vector<16x128xf32>,
    return
  }
}

</mosaic_0001>

<bundles_post_ra>
// kernel: gcn_forward.1
= control target key start
LH: loop header
LB: loop body
LE: loop exit
PB: predicated region body
PF: predicated region fallthrough
CT: control target
= control target key end

     0   :  { %16 = vsyncpa [#allocation4], 0  ;;  %s1110_s0 = inlined_call_operand.vmem [shape: bf16[16,8], index: 0, kind: input, shape index: {}]   ;;  %s1111_s1 = inlined_call_operand.vmem [shape: bf16[16,16], index: 1, kind: input, shape index: {}]   ;;  %s1112_s2 = inlined_call_operand.vmem [shape: bf16[8,64], index: 2, kind: input, shape index: {}]   ;;  %s1113_s3 = inlined_call_operand.vmem [shape: f32[1,32], index: 3, kind: input, shape index: {}]   ;;  %s1114_s4 = inlined_call_operand.vmem [shape: f32[1,32], index: 4, kind: input, shape index: {}]   ;;  %s1115_s5 = inlined_call_operand.vmem [shape: bf16[2,40,64], index: 5, kind: input, shape index: {}]   ;;  %s1116_s6 = inlined_call_operand.vmem [shape: f32[2,1,32], index: 6, kind: input, shape index: {}]   ;;  %s1117_s7 = inlined_call_operand.vmem [shape: f32[2,1,32], index: 7, kind: input, shape index: {}]   ;;  %s1118_s8 = inlined_call_operand.hbm [shape: bf16[40,256], index: 8, kind: input, shape index: {}]   ;;  %s1119_s9 = inlined_call_operand.hbm [shape: f32[1,128], index: 9, kind: input, shape index: {}]   ;;  %s1120_s10 = inlined_call_operand.hbm [shape: f32[1,128], index: 10, kind: input, shape index: {}]   ;;  %s1121_s11 = inlined_call_operand.vmem [shape: f32[16,128], index: 11, kind: output, shape index: {}]  }
   0x1   :  { %17 = vsyncpa [#allocation6], 0  ;;  %s891_s17 = smov [#allocation5]   ;;  %s892_s19 = smov [#allocation3]  }
   0x2   :  { %s52_s18 = sshll.u32 %s891_s17, 4  ;;  %s39_s20 = sshll.u32 %s892_s19, 4  ;;  %s53_s18 = int_to_ptr.vmem [resolvable:$true] %s52_s18  ;;  %s960_s20 = int_to_ptr.vmem [resolvable:$true] %s39_s20 }
   0x3   :  { %s821_s23 = scalar_lea.hbm %s1119_s9, 16 }
   0x4   :  { %p822_p0 = scmp.ne.s32.totalorder %s1119_s9, %s821_s23  ;;  %p825_p1 = scmp.lt.u32.totalorder %s821_s23, %s1119_s9 }
   0x6   :  { %p827_p2 = pnand %p825_p1, %p822_p0 }
   0x8   :  { %830 = shalt.err (!%p827_p2)
}
   0x9   :  { %s831_s28 = scalar_lea.vmem %s53_s18, 16  ;;  %s835_s29 = scalar_lea.vmem %s53_s18, 32 }
   0xa   :  { %p832_p3 = scmp.ne.s32.totalorder %s53_s18, %s831_s28  ;;  %p836_p4 = scmp.lt.s32.totalorder %s53_s18, %s53_s18 }
   0xb   :  { %p837_p5 = scmp.lt.s32.totalorder %s835_s29, %s831_s28 }
   0xd   :  { %p838_p6 = por %p837_p5, %p836_p4 }
   0xf   :  { %p839_p7 = pnand %p838_p6, %p832_p3 }
  0x11   :  { %842 = shalt.err (!%p839_p7)
}
  0x12   :  { %55 = dma.hbm_to_vmem [thread:$0]  %s1119_s9, 16, %s53_s18, [#allocation6]  }
  0x13   :  { %s843_s15 = scalar_lea.hbm %s1118_s8, 640 }
  0x14   :  { %p844_p8 = scmp.ne.s32.totalorder %s1118_s8, %s843_s15  ;;  %p847_p9 = scmp.lt.u32.totalorder %s843_s15, %s1118_s8 }
  0x16   :  { %p849_p10 = pnand %p847_p9, %p844_p8 }
  0x18   :  { %852 = shalt.err (!%p849_p10)
}
  0x19   :  { %s853_s22 = scalar_lea.vmem %s960_s20, 640  ;;  %p858_p12 = scmp.lt.s32.totalorder %s960_s20, %s960_s20 }
  0x1a   :  { %p854_p11 = scmp.ne.s32.totalorder %s960_s20, %s853_s22  ;;  %p859_p13 = scmp.lt.s32.totalorder %s853_s22, %s853_s22 }
  0x1c   :  { %p860_p0 = por %p859_p13, %p858_p12 }
  0x1e   :  { %p861_p1 = pnand %p860_p0, %p854_p11 }
  0x20   :  { %864 = shalt.err (!%p861_p1)
}
  0x21   :  { %s893_s9 = smov 128   ;;  %s894_s18 = smov 8  }
  0x22   :  { %45 = dma.hbm_to_vmem [thread:$0]  %s1118_s8, 640, %s960_s20, [#allocation4], %s893_s9, %s893_s9, %s894_s18  }
  0x23   :  { %s895_s25 = smov [#allocation7]   ;;  %s865_s29 = scalar_lea.hbm %s1120_s10, 16 }
  0x24   :  { %s62_s26 = sshll.u32 %s895_s25, 4  ;;  %p866_p2 = scmp.ne.s32.totalorder %s1120_s10, %s865_s29  ;;  %s63_s26 = int_to_ptr.vmem [resolvable:$true] %s62_s26 }
  0x25   :  { %p869_p3 = scmp.lt.u32.totalorder %s865_s29, %s1120_s10 }
  0x27   :  { %p871_p4 = pnand %p869_p3, %p866_p2 }
  0x29   :  { %874 = shalt.err (!%p871_p4)
}
  0x2a   :  { %s875_s15 = scalar_lea.vmem %s63_s26, 16  ;;  %s879_s8 = scalar_lea.vmem %s63_s26, 32 }
  0x2b   :  { %p876_p5 = scmp.ne.s32.totalorder %s63_s26, %s875_s15  ;;  %p880_p6 = scmp.lt.s32.totalorder %s63_s26, %s63_s26 }
  0x2c   :  { %p881_p7 = scmp.lt.s32.totalorder %s879_s8, %s875_s15 }
  0x2e   :  { %p882_p8 = por %p881_p7, %p880_p6 }
  0x30   :  { %p883_p9 = pnand %p882_p8, %p876_p5 }
  0x32   :  { %886 = shalt.err (!%p883_p9)
}
  0x33   :  { %65 = dma.hbm_to_vmem [thread:$0]  %s1120_s10, 16, %s63_s26, [#allocation6]  }
  0x34   :  { %887 = dma.done.wait [#allocation4], 640  }
  0x35   :  { %888 = vsyncadd [#allocation4], 4294966656 }
  0x36   :  { %889 = dma.done.wait [#allocation6], 32  }
  0x37   :  { %890 = vsyncadd [#allocation6], 4294967264  ;;  %v896_v0 = vmov 0.0   ;;  %vm897_vm0 = vmmov 0   ;;  %vm94_vm1 = vcmask 1043456   ;;  %vm86_vm2 = vcmask 64512  }
  0x38   :  { %738 = vmatprep.subr.bf16.mxu0 %v896_v0  ;;  %740 = vmatprep.mubr.msk.bf16.mxu0 %vm897_vm0, %v896_v0  ;;  %v88_v1 = vld [vmem:[%s1112_s2] sm:$0xf]  ;;  %s898_s22 = smov 96   ;;  %vm153_vm3 = vcmask 130048   ;;  %v800_v12 = vld [vmem:[%s1115_s5 + $0x8] sm:$0xff]   ;;  %vm219_vm4 = vcmask 326720  }
  0x39   :  { %744 = vmatprep.subr.bf16.mxu1 %v896_v0  ;;  %746 = vmatprep.mubr.msk.bf16.mxu1 %vm897_vm0, %v896_v0  ;;  %v96_v2 = vsel %vm94_vm1, %v88_v1, 0  ;;  %v797_v3 = vld [vmem:[%s1110_s0] sm:$0xff]   ;;  %v801_v13 = vld [vmem:[%s1115_s5 + $0x10] ss:$0 sps:$4 sm:$0xff]   ;;  %vm244_vm5 = vcmask 326656   ;;  %v802_v36 = vld [vmem:[%s1115_s5 + $0x14] sm:$0xff]  }
  0x3a   :  { %739 = vmatpush3.bf16.msra.mxu0 %v96_v2  ;;  %87 = vst.msk [vmem:[#allocation2] sm:$0xff] %vm86_vm2, %v797_v3  ;;  %v1024_v9 = vld [vmem:[%s1111_s1] sm:$0xff]   ;;  %v249_v16 = vsel %vm94_vm1, %v801_v13, 0  ;;  %v805_v62 = vld [vmem:[#allocation3] ss:$8 sps:$4 sm:$0xff]  }
  0x3b   :  { %750 = vmatprep.subr.bf16.mxu0 %v896_v0  ;;  %v799_v10 = vld [vmem:[%s1115_s5] sm:$0xff]   ;;  %v807_v63 = vld [vmem:[#allocation3 + $0x4] ss:$8 sps:$4 sm:$0xff]  }
  0x3c   :  { %v686_v14 = vld [vmem:[%s1113_s3] ss:$0 sm:$0xff]  ;;  %v804_v38 = vld [vmem:[%s1115_s5 + $0x24] ss:$0 sps:$4 sm:$0xff]  }
  0x3d   :  { %741 = vmatmul.mubr.msk.bf16.vlgmr.msra.gmra.mrb[0].mxu0 %vm86_vm2, %v797_v3  ;;  %v687_v24 = vld [vmem:[%s1114_s4] ss:$0 sm:$0xff]  ;;  %v394_v42 = vsel %vm94_vm1, %v804_v38, 0  ;;  %v810_v1 = vld [vmem:[#allocation3 + $0x14] ss:$8 sps:$4 sm:$0xff]  }
  0x3e   :  { %756 = vmatprep.mubr.msk.bf16.mxu0 %vm897_vm0, %v896_v0  ;;  %751 = vmatpush3.bf16.msra.mxu0 %v799_v10  ;;  %v803_v37 = vld [vmem:[%s1115_s5 + $0x1c] sm:$0xff]  }
  0x3f   :  { %752 = vmatprep.subr.bf16.mxu0 %v896_v0  ;;  %v693_v40 = vld [vmem:[%s1116_s6] ss:$0 sm:$0xff] }
  0x40   :  { %v694_v50 = vld [vmem:[%s1117_s7] ss:$0 sm:$0xff] }
  0x41   :  { %v808_v2 = vld [vmem:[#allocation3 + $0x10] ss:$8 sps:$4 sm:$0xff]  }
  0x42   :  { %753 = vmatpush3.bf16.msra.mxu0 %v800_v12 }
  0x43   :  { %754 = vmatprep.subr.bf16.mxu0 %v896_v0 }
  0x46   :  { %755 = vmatpush3.bf16.msra.mxu0 %v249_v16 }
  0x47   :  { %776 = vmatprep.subr.bf16.mxu0 %v896_v0 }
 0x110   :  { %v132_v4 = vpop.f32.mrb[0].mxu0 }
 0x111   :  { %147 = vrot.lane.b32.xlu0 %v132_v4, %s898_s22  ;;  %v742_v5 = vpop.f32.mrb[1].mxu0 }
 0x112   :  { %v135_v6 = vpop.f32.mrb[2].mxu0  ;;  %v899_v5 = vmov 0  }
 0x113   :  { %v743_v7 = vpop.f32.mrb[3].mxu0  ;;  %v139_v8 = vpack.c.bf16 %v135_v6, %v132_v4 }
 0x114   :  { %v707_v7 = vld [vmem:[%s1116_s6 + $0x1] ss:$0 sm:$0xff] }
 0x115   :  { %149 = vrot.lane.b32.xlu0 %v135_v6, %s898_s22  ;;  %745 = vmatpush3.bf16.msra.mxu1 %v139_v8 }
 0x116   :  { %760 = vmatprep.subr.bf16.mxu1 %v896_v0 }
 0x118   :  { %747 = vmatmul.mubr.msk.bf16.vlgmr.msra.gmra.mrb[0].mxu1 %vm153_vm3, %v1024_v9 }
 0x119   :  { %762 = vmatprep.mubr.msk.bf16.mxu1 %vm897_vm0, %v896_v0 }
 0x183   :  { %v148_v11 = vpop.permute.xlu0 %147 }
 0x187   :  { %v150_v19 = vpop.permute.xlu0 %149 }
 0x1eb   :  { %v191_v15 = vpop.f32.mrb[0].mxu1 }
 0x1ec   :  { %v192_v17 = vadd.f32 %v191_v15, %v148_v11  ;;  %v748_v18 = vpop.f32.mrb[1].mxu1 }
 0x1ed   :  { %v194_v20 = vpop.f32.mrb[2].mxu1  ;;  %v708_v18 = vld [vmem:[%s1117_s7 + $0x1] ss:$0 sm:$0xff] }
 0x1ee   :  { %v204_v21 = vmul.f32 %v686_v14, %v192_v17  ;;  %v195_v22 = vadd.f32 %v194_v20, %v150_v19  ;;  %v749_v23 = vpop.f32.mrb[3].mxu1 }
 0x1f0   :  { %v205_v25 = vmul.f32 %v686_v14, %v195_v22  ;;  %v212_v26 = vadd.f32 %v687_v24, %v204_v21 }
 0x1f2   :  { %v213_v27 = vadd.f32 %v687_v24, %v205_v25 }
 0x1f4   :  { %v214_v28 = vpack.c.bf16 %v213_v27, %v212_v26 }
 0x1f6   :  { %216 = vrot.lane.b32.xlu1 %v214_v28, %s894_s18 }
 0x268   :  { %v217_v29 = vpop.permute.xlu1 %216 }
 0x269   :  { %220 = vst.msk [vmem:[#allocation2] sm:$0xff] %vm219_vm4, %v217_v29 }
 0x270   :  { %v221_v30 = vld [vmem:[#allocation2] sm:$0xff] }
 0x271   :  { %757 = vmatmul.mubr.msk.bf16.vlgmr.msra.gmra.mrb[4].mxu0 %vm244_vm5, %v221_v30  ;;  %v718_v30 = vld [vmem:[#allocation5] ss:$0 sm:$0xff] }
 0x272   :  { %778 = vmatprep.mubr.msk.bf16.mxu0 %vm897_vm0, %v896_v0 }
 0x344   :  { %v285_v31 = vpop.f32.mrb[4].mxu0 }
 0x345   :  { %295 = vrot.lane.b32.xlu1 %v285_v31, %s898_s22  ;;  %v758_v32 = vpop.f32.mrb[5].mxu0 }
 0x346   :  { %v288_v33 = vpop.f32.mrb[6].mxu0 }
 0x347   :  { %v292_v34 = vpack.c.bf16 %v288_v33, %v285_v31  ;;  %297 = vrot.lane.b32.xlu0 %v288_v33, %s898_s22  ;;  %v759_v35 = vpop.f32.mrb[7].mxu0 }
 0x348   :  { %v719_v35 = vld [vmem:[#allocation7] ss:$0 sm:$0xff] }
 0x349   :  { %761 = vmatpush3.bf16.msra.mxu1 %v292_v34 }
 0x34a   :  { %766 = vmatprep.subr.bf16.mxu1 %v896_v0 }
 0x34c   :  { %763 = vmatmul.mubr.msk.bf16.vlgmr.msra.gmra.mrb[4].mxu1 %vm153_vm3, %v1024_v9 }
 0x34d   :  { %772 = vmatprep.mubr.msk.bf16.mxu1 %vm897_vm0, %v896_v0  ;;  %767 = vmatpush3.bf16.msra.mxu1 %v802_v36 }
 0x34e   :  { %768 = vmatprep.subr.bf16.mxu1 %v896_v0 }
 0x351   :  { %769 = vmatpush3.bf16.msra.mxu1 %v803_v37 }
 0x352   :  { %770 = vmatprep.subr.bf16.mxu1 %v896_v0 }
 0x355   :  { %771 = vmatpush3.bf16.msra.mxu1 %v394_v42 }
 0x356   :  { %782 = vmatprep.subr.bf16.mxu1 %v896_v0 }
 0x3b7   :  { %v296_v39 = vpop.permute.xlu1 %295 }
 0x3b9   :  { %v298_v45 = vpop.permute.xlu0 %297 }
 0x41f   :  { %v335_v41 = vpop.f32.mrb[4].mxu1 }
 0x420   :  { %v336_v43 = vadd.f32 %v335_v41, %v296_v39  ;;  %v764_v44 = vpop.f32.mrb[5].mxu1 }
 0x421   :  { %v338_v46 = vpop.f32.mrb[6].mxu1 }
 0x422   :  { %v348_v47 = vmul.f32 %v693_v40, %v336_v43  ;;  %v339_v48 = vadd.f32 %v338_v46, %v298_v45  ;;  %v765_v49 = vpop.f32.mrb[7].mxu1 }
 0x424   :  { %v349_v51 = vmul.f32 %v693_v40, %v339_v48  ;;  %v356_v52 = vadd.f32 %v694_v50, %v348_v47 }
 0x426   :  { %v357_v53 = vadd.f32 %v694_v50, %v349_v51 }
 0x428   :  { %v358_v54 = vpack.c.bf16 %v357_v53, %v356_v52 }
 0x42a   :  { %360 = vrot.lane.b32.xlu1 %v358_v54, %s894_s18 }
 0x49c   :  { %v361_v55 = vpop.permute.xlu1 %360 }
 0x49d   :  { %363 = vst.msk [vmem:[#allocation2] sm:$0xff] %vm219_vm4, %v361_v55 }
 0x4a4   :  { %v364_v56 = vld [vmem:[#allocation2] sm:$0xff] }
 0x4a5   :  { %773 = vmatmul.mubr.msk.bf16.vlgmr.msra.gmra.mrb[8].mxu1 %vm244_vm5, %v364_v56 }
 0x4a6   :  { %784 = vmatprep.mubr.msk.bf16.mxu1 %vm897_vm0, %v896_v0  ;;  %v514_v0 = vld [vmem:[#allocation3 + $0x20] sm:$0xff] }
 0x4a7   :  { %v714_v3 = vcombine.high %v514_v0, %v514_v0  ;;  %v713_v4 = vcombine.low %v514_v0, %v514_v0 }
 0x4a9   :  { %v546_v12 = vsel %vm94_vm1, %v713_v4, 0 }
 0x578   :  { %v430_v57 = vpop.f32.mrb[8].mxu1 }
 0x579   :  { %440 = vrot.lane.b32.xlu0 %v430_v57, %s898_s22  ;;  %v774_v58 = vpop.f32.mrb[9].mxu1 }
 0x57a   :  { %v433_v59 = vpop.f32.mrb[10].mxu1 }
 0x57b   :  { %v437_v60 = vpack.c.bf16 %v433_v59, %v430_v57  ;;  %442 = vrot.lane.b32.xlu1 %v433_v59, %s898_s22  ;;  %v775_v61 = vpop.f32.mrb[11].mxu1 }
 0x57d   :  { %777 = vmatpush3.bf16.msra.mxu0 %v437_v60 }
 0x57e   :  { %551 = vmatprep.subr.bf16.mxu0 %v807_v63 }
 0x580   :  { %779 = vmatmul.mubr.msk.bf16.vlgmr.msra.gmra.mrb[8].mxu0 %vm153_vm3, %v1024_v9 }
 0x581   :  { %552 = vmatpush1.bf16.msra.mxu0 %v805_v62  ;;  %583 = vmatprep.mubr.bf16.mxu0 %v899_v5 }
 0x582   :  { %553 = vmatprep.subr.bf16.mxu0 %v810_v1 }
 0x585   :  { %554 = vmatpush1.bf16.msra.mxu0 %v808_v2 }
 0x586   :  { %715 = vmatprep.subr.msk.bf16.mxu0 %vm94_vm1, %v714_v3 }
 0x589   :  { %556 = vmatpush1.bf16.msra.mxu0 %v546_v12 }
 0x5eb   :  { %v441_v6 = vpop.permute.xlu0 %440 }
 0x5ed   :  { %v443_v13 = vpop.permute.xlu1 %442 }
 0x653   :  { %v480_v8 = vpop.f32.mrb[8].mxu0 }
 0x654   :  { %v481_v10 = vadd.f32 %v480_v8, %v441_v6  ;;  %v780_v11 = vpop.f32.mrb[9].mxu0 }
 0x655   :  { %v483_v14 = vpop.f32.mrb[10].mxu0 }
 0x656   :  { %v493_v15 = vmul.f32 %v707_v7, %v481_v10  ;;  %v484_v16 = vadd.f32 %v483_v14, %v443_v13  ;;  %v781_v17 = vpop.f32.mrb[11].mxu0 }
 0x658   :  { %v494_v19 = vmul.f32 %v707_v7, %v484_v16  ;;  %v501_v20 = vadd.f32 %v708_v18, %v493_v15 }
 0x65a   :  { %v502_v21 = vadd.f32 %v708_v18, %v494_v19 }
 0x65c   :  { %v503_v22 = vpack.c.bf16 %v502_v21, %v501_v20 }
 0x65e   :  { %505 = vrot.lane.b32.xlu0 %v503_v22, %s894_s18 }
 0x6d0   :  { %v506_v23 = vpop.permute.xlu0 %505 }
 0x6d1   :  { %508 = vst.msk [vmem:[#allocation2] sm:$0xff] %vm219_vm4, %v506_v23 }
 0x6d8   :  { %v509_v24 = vld [vmem:[#allocation2] sm:$0xff] }
 0x6d9   :  { %716 = vmatmul.mubr.msk.bf16.vlgmr.msra.gmra.mrb[12].mxu0 %vm244_vm5, %v509_v24 }
 0x7ac   :  { %v585_v25 = vpop.f32.mrb[12].mxu0 }
 0x7ad   :  { %v587_v26 = vpop.f32.mrb[13].mxu0 }
 0x7ae   :  { %v589_v27 = vpop.f32.mrb[14].mxu0 }
 0x7af   :  { %v594_v28 = vpack.c.bf16 %v589_v27, %v585_v25  ;;  %v591_v29 = vpop.f32.mrb[15].mxu0 }
 0x7b1   :  { %783 = vmatpush3.bf16.msra.mxu1 %v594_v28 }
 0x7b4   :  { %785 = vmatmul.mubr.msk.bf16.vlgmr.msra.gmra.mrb[12].mxu1 %vm153_vm3, %v1024_v9 }
 0x887   :  { %v629_v31 = vpop.f32.mrb[12].mxu1 }
 0x888   :  { %v630_v32 = vadd.f32 %v629_v31, %v587_v26  ;;  %v786_v33 = vpop.f32.mrb[13].mxu1 }
 0x889   :  { %v632_v34 = vpop.f32.mrb[14].mxu1 }
 0x88a   :  { %v642_v36 = vmul.f32 %v718_v30, %v630_v32  ;;  %v633_v37 = vadd.f32 %v632_v34, %v591_v29  ;;  %v787_v38 = vpop.f32.mrb[15].mxu1 }
 0x88c   :  { %v643_v39 = vmul.f32 %v718_v30, %v633_v37  ;;  %v650_v40 = vadd.f32 %v719_v35, %v642_v36 }
 0x88e   :  { %652 = vmax.xlane.f32.xlu1 %v650_v40  ;;  %v651_v41 = vadd.f32 %v719_v35, %v643_v39 }
 0x890   :  { %654 = vmax.xlane.f32.xlu0 %v651_v41 }
 0x91b   :  { %v653_v42 = vpop.xlane.xlu1 %652 }
 0x91c   :  { %v656_v43 = vsub.f32 %v650_v40, %v653_v42 }
 0x91d   :  { %v655_v44 = vpop.xlane.xlu0 %654 }
 0x91e   :  { %v658_v45 = vmul.f32 1.442695, %v656_v43  ;;  %v657_v46 = vsub.f32 %v651_v41, %v655_v44 }
 0x920   :  { %813 = vpow2.f32 %v658_v45  ;;  %v660_v9 = vmul.f32 1.442695, %v657_v46 }
 0x922   :  { %815 = vpow2.f32 %v660_v9 }
 0x92a   :  { %v814_v47 = vpop.eup %813 }
 0x92b   :  { %662 = vadd.xlane.f32.xlu0 %v814_v47 }
 0x92c   :  { %v816_v48 = vpop.eup %815 }
 0x92d   :  { %664 = vadd.xlane.f32.xlu1 %v816_v48 }
 0x9b8   :  { %v663_v49 = vpop.xlane.xlu0 %662 }
 0x9b9   :  { %817 = vlog2.f32 %v663_v49 }
 0x9ba   :  { %v665_v50 = vpop.xlane.xlu1 %664 }
 0x9bb   :  { %819 = vlog2.f32 %v665_v50 }
 0x9c3   :  { %v818_v51 = vpop.eup %817 }
 0x9c4   :  { %v667_v52 = vmul.f32 0.6931472, %v818_v51 }
 0x9c5   :  { %v820_v53 = vpop.eup %819 }
 0x9c6   :  { %v670_v54 = vadd.f32 %v667_v52, %v653_v42  ;;  %v669_v55 = vmul.f32 0.6931472, %v820_v53 }
 0x9c8   :  { %v672_v56 = vsub.f32 %v650_v40, %v670_v54  ;;  %v671_v57 = vadd.f32 %v669_v55, %v655_v44 }
 0x9ca   :  { %674 = vst [vmem:[%s1121_s11] sm:$0xff] %v672_v56  ;;  %v673_v58 = vsub.f32 %v651_v41, %v671_v57 }
 0x9cc   :  { %675 = vst [vmem:[%s1121_s11 + $0x8] sm:$0xff] %v673_v58 }
 0x9cd   :  { %680 = vsyncpa [#allocation4], 1 }
 0x9ce   :  { %681 = vsyncpa [#allocation6], 1 }

</bundles_post_ra>
